<compile_context>
chip_gen: v6e
topology: v6e:2x2x1
jax: 0.10.0
libtpu: 0.0.40
codegen_flags: <defaults>
</compile_context>

<pallas_src>
import functools

import jax
import jax.numpy as jnp
from jax.experimental import pallas as pl
from jax.experimental.pallas import tpu as pltpu


def _dropout_kernel(seed_ref, x_ref, o_ref, *, threshold_u32, inv_keep):
    tile_r, w = x_ref.shape

    # Global flat element index of every element in this tile.
    row0 = pl.program_id(0) * tile_r
    ri = jax.lax.broadcasted_iota(jnp.int32, (tile_r, w), 0)
    ci = jax.lax.broadcasted_iota(jnp.int32, (tile_r, w), 1)
    gid = ((row0 + ri) * w + ci).astype(jnp.uint32)

    seed_u = seed_ref[0].astype(jnp.uint32)

    # Stateless hash (odd-constant multiply + fmix-style finalizer).  Tiling
    # independent: element i always gets the same random bit for a given seed.
    h = gid * jnp.uint32(0x9E3779B1) + seed_u * jnp.uint32(0x85EBCA77)
    h = h ^ (h >> 16)
    h = h * jnp.uint32(0x21F0AAAD)
    h = h ^ (h >> 15)
    h = h * jnp.uint32(0x735A2D97)
    h = h ^ (h >> 15)

    keep = h < jnp.uint32(threshold_u32)          # P(keep) = 1 - p

    x = x_ref[...]                                # native dtype (f32/bf16/...)
    scale = jnp.asarray(inv_keep, dtype=x.dtype)
    o_ref[...] = jnp.where(keep, x * scale, jnp.zeros_like(x))


def wrapped_dropout(x, p: float = 0.5, training: bool = True,
                    inplace: bool = False, seed: int = 0):
    """Pallas implementation of WrappedDropout.forward (i.e. F.dropout).

    `inplace` is accepted for API parity; JAX is functional so a new array is
    always returned.
    """
    if p < 0.0 or p > 1.0:
        raise ValueError(f"dropout probability has to be between 0 and 1, but got {p}")
    if (not training) or p == 0.0:
        return x
    if p == 1.0:
        return jnp.zeros_like(x)

    orig_shape = x.shape
    orig_dtype = x.dtype
    n = x.size
    itemsize = jnp.dtype(orig_dtype).itemsize

    # Lane-dense slab width: widest of {1024,...,128} that divides n avoids
    # any wrapper-side pad/slice HBM copies.
    W = None
    for w in (1024, 512, 256, 128):
        if n % w == 0:
            W = w
            break
    if W is None:
        W = 1024  # must pad anyway; use the widest slab

    n_pad = pl.cdiv(n, W) * W
    x_flat = x.reshape(-1)
    if n_pad != n:
        # TODO(synk): mask the tail inside the kernel to avoid this extra
        # read+write pass; lane-aligned sizes (n % 128 == 0) never take it.
        x_flat = jnp.pad(x_flat, (0, n_pad - n))
    rows = n_pad // W
    x2d = x_flat.reshape(rows, W)

    # ~2 MiB blocks: large enough to amortize per-grid-step overhead and reach
    # the HBM roofline; small enough (4 double-buffered in/out buffers + u32
    # hash temporaries) for every generation's default scoped VMEM, including
    # v7x's 64 MiB total.
    TARGET_BLOCK_BYTES = 2 * 1024 * 1024
    target_rows = max(32, (TARGET_BLOCK_BYTES // (W * itemsize)) // 32 * 32)
    if rows <= target_rows:
        tile_r = rows                  # single block == full array dims
        grid = (1,)
    else:
        tile_r = target_rows           # multiple of 32 -> valid sublane tiling
        grid = (pl.cdiv(rows, tile_r),)  # ragged last block masked by Pallas

    keep_prob = 1.0 - p
    threshold_u32 = min(int(round(keep_prob * 4294967296.0)), 2**32 - 1)
    inv_keep = 1.0 / keep_prob

    kernel = functools.partial(
        _dropout_kernel, threshold_u32=threshold_u32, inv_keep=inv_keep
    )
    seed_arr = jnp.array([seed], dtype=jnp.int32)

    out2d = pl.pallas_call(
        kernel,
        out_shape=jax.ShapeDtypeStruct((rows, W), orig_dtype),
        grid_spec=pltpu.PrefetchScalarGridSpec(
            num_scalar_prefetch=1,
            grid=grid,
            in_specs=[pl.BlockSpec((tile_r, W), lambda i, seed: (i, 0))],
            out_specs=pl.BlockSpec((tile_r, W), lambda i, seed: (i, 0)),
        ),
        compiler_params=pltpu.CompilerParams(
            # Tiles are fully independent (stateless hash RNG) -> let v7x
            # shard the grid across both TensorCores; harmless on v5e/v6e.
            dimension_semantics=("parallel",),
        ),
        cost_estimate=pl.CostEstimate(
            flops=8 * n, transcendentals=0, bytes_accessed=2 * n * itemsize
        ),
    )(seed_arr, x2d)

    if n_pad == n:
        return out2d.reshape(orig_shape)
    return out2d.reshape(-1)[:n].reshape(orig_shape)


if __name__ == "__main__":
    key = jax.random.PRNGKey(0)
    # NCHW input consistent with a typical conv-style activation.
    x = jax.random.normal(key, (2, 4, 16, 16), dtype=jnp.float32)

    p = 0.5
    y = wrapped_dropout(x, p=p, training=True, seed=1234)
    y = jax.block_until_ready(y)

    # Sanity checks on dropout semantics.
    assert y.shape == x.shape and y.dtype == x.dtype
    kept = y != 0.0
    # Kept elements must equal x / (1-p) exactly (scale=2.0 is exact in f32).
    scale = 1.0 / (1.0 - p)
    assert jnp.allclose(jnp.where(kept, y, 0.0), jnp.where(kept, x * scale, 0.0),
                        rtol=1e-6, atol=1e-6)
    # Keep fraction should be roughly (1-p).
    frac = float(jnp.mean(kept.astype(jnp.float32)))
    assert 0.35 < frac < 0.65, f"unexpected keep fraction {frac}"

    # Determinism: same seed -> identical mask.
    y2 = jax.block_until_ready(wrapped_dropout(x, p=p, training=True, seed=1234))
    assert jnp.array_equal(y, y2)

    # Eval mode: identity.
    y_eval = jax.block_until_ready(wrapped_dropout(x, p=p, training=False))
    assert jnp.array_equal(y_eval, x)

    print("KERNEL_OK")
</pallas_src>

<mosaic_0001>
module attributes {stable_mosaic.version = 11 : i64} {
  func.func @_dropout_kernel(%arg0: i32, %arg1: memref<1xi32, #tpu.memory_space<smem>>, %arg2: memref<2x1024xf32, #tpu.memory_space<vmem>>, %arg3: memref<2x1024xf32, #tpu.memory_space<vmem>>) attributes {dimension_semantics = [#tpu.dimension_semantics<parallel>], iteration_bounds = array<i64: 1>, scalar_prefetch = 1 : i64, scratch_operands = 0 : i64, tpu.core_type = #tpu.core_type<tc>, window_params = [{transform_indices = @transform_0, window_bounds = array<i64: 2, 1024>}, {transform_indices = @transform_1, window_bounds = array<i64: 2, 1024>}]} {
    %c2_i32 = arith.constant 2 : i32
    %0 = arith.muli %arg0, %c2_i32 : i32
    %1 = tpu.iota {dimensions = array<i32: 0>} : vector<2x1024xi32>
    %2 = tpu.iota {dimensions = array<i32: 1>} : vector<2x1024xi32>
    %3 = vector.broadcast %0 : i32 to vector<2x1024xi32>
    %4 = arith.addi %3, %1 : vector<2x1024xi32>
    %c1024_i32 = arith.constant 1024 : i32
    %5 = vector.broadcast %c1024_i32 : i32 to vector<2x1024xi32>
    %6 = arith.muli %4, %5 : vector<2x1024xi32>
    %7 = arith.addi %6, %2 : vector<2x1024xi32>
    %c0 = arith.constant 0 : index
    %8 = memref.load %arg1[%c0] : memref<1xi32, #tpu.memory_space<smem>>
    %c-1640531535_i32 = arith.constant -1640531535 : i32
    %9 = vector.broadcast %c-1640531535_i32 : i32 to vector<2x1024xi32>
    %10 = arith.muli %7, %9 : vector<2x1024xi32>
    %c-2048144777_i32 = arith.constant -2048144777 : i32
    %11 = arith.muli %8, %c-2048144777_i32 : i32
    %12 = vector.broadcast %11 : i32 to vector<2x1024xi32>
    %13 = arith.addi %10, %12 : vector<2x1024xi32>
    %c16_i32 = arith.constant 16 : i32
    %14 = vector.broadcast %c16_i32 : i32 to vector<2x1024xi32>
    %15 = arith.shrui %13, %14 : vector<2x1024xi32>
    %16 = arith.xori %13, %15 : vector<2x1024xi32>
    %c569420461_i32 = arith.constant 569420461 : i32
    %17 = vector.broadcast %c569420461_i32 : i32 to vector<2x1024xi32>
    %18 = arith.muli %16, %17 : vector<2x1024xi32>
    %c15_i32 = arith.constant 15 : i32
    %19 = vector.broadcast %c15_i32 : i32 to vector<2x1024xi32>
    %20 = arith.shrui %18, %19 : vector<2x1024xi32>
    %21 = arith.xori %18, %20 : vector<2x1024xi32>
    %c1935289751_i32 = arith.constant 1935289751 : i32
    %22 = vector.broadcast %c1935289751_i32 : i32 to vector<2x1024xi32>
    %23 = arith.muli %21, %22 : vector<2x1024xi32>
    %c15_i32_0 = arith.constant 15 : i32
    %24 = vector.broadcast %c15_i32_0 : i32 to vector<2x1024xi32>
    %25 = arith.shrui %23, %24 : vector<2x1024xi32>
    %26 = arith.xori %23, %25 : vector<2x1024xi32>
    %c-2147483648_i32 = arith.constant -2147483648 : i32
    %27 = vector.broadcast %c-2147483648_i32 : i32 to vector<2x1024xi32>
    %28 = arith.cmpi ult, %26, %27 : vector<2x1024xi32>
    %c0_1 = arith.constant 0 : index
    %c0_2 = arith.constant 0 : index
    %29 = vector.load %arg2[%c0_1, %c0_2] : memref<2x1024xf32, #tpu.memory_space<vmem>>, vector<2x1024xf32>
    %cst = arith.constant 2.000000e+00 : f32
    %30 = vector.broadcast %cst : f32 to vector<2x1024xf32>
    %31 = arith.mulf %29, %30 : vector<2x1024xf32>
    %cst_3 = arith.constant 0.000000e+00 : f32
    %32 = vector.broadcast %cst_3 : f32 to vector<2x1024xf32>
    %33 = arith.select %28, %31, %32 : vector<2x1024xi1>, vector<2x1024xf32>
    %c0_4 = arith.constant 0 : index
    %c0_5 = arith.constant 0 : index
    %34 = vector.load %arg3[%c0_4, %c0_5] : memref<2x1024xf32, #tpu.memory_space<vmem>>, vector<2x1024xf32>
    tpu.vector_store %arg3[%c0_4, %c0_5], %33 {strides = array<i32>} : memref<2x1024xf32, #tpu.memory_space<vmem>>, vector<2x1024xf32>,
    return
  }
  func.func @transform_0(%arg0: i32, %arg1: memref<1xi32, #tpu.memory_space<smem>>) -> (i32, i32) {
    %c0_i32 = arith.constant 0 : i32
    %c0_i32_0 = arith.constant 0 : i32
    return %arg0, %c0_i32 : i32, i32
  }
  func.func @transform_1(%arg0: i32, %arg1: memref<1xi32, #tpu.memory_space<smem>>) -> (i32, i32) {
    %c0_i32 = arith.constant 0 : i32
    %c0_i32_0 = arith.constant 0 : i32
    return %arg0, %c0_i32 : i32, i32
  }
}

</mosaic_0001>

<bundles_post_ra>
// kernel: tpu_custom_call.1
= control target key start
LH: loop header
LB: loop body
LE: loop exit
PB: predicated region body
PF: predicated region fallthrough
CT: control target
= control target key end

     0   :  { %8 = vsyncpa [#allocation5], 0  ;;  %s359_s0 = inlined_call_operand.<no memory space> [shape: s32[1], index: 0, kind: input, shape index: {}]   ;;  %s360_s1 = inlined_call_operand.hbm [shape: f32[2,1024], index: 1, kind: input, shape index: {}]   ;;  %s361_s2 = inlined_call_operand.hbm [shape: f32[2,1024], index: 2, kind: output, shape index: {}]  }
   0x1   :  { %9 = vsyncpa [#allocation6], 0  ;;  %s301_s9 = smov [#allocation4]  }
   0x2   :  { %s16_s10 = sshll.u32 %s301_s9, 4  ;;  %s17_s10 = int_to_ptr.vmem [resolvable:$true] %s16_s10 }
   0x3   :  { %s265_s11 = scalar_lea.vmem %s17_s10, 256  ;;  %p270_p1 = scmp.lt.s32.totalorder %s17_s10, %s17_s10 }
   0x4   :  { %p266_p0 = scmp.ne.s32.totalorder %s17_s10, %s265_s11  ;;  %p271_p2 = scmp.lt.s32.totalorder %s265_s11, %s265_s11 }
   0x6   :  { %p272_p3 = por %p271_p2, %p270_p1 }
   0x8   :  { %p273_p4 = pnand %p272_p3, %p266_p0 }
   0xa   :  { %276 = shalt.err (!%p273_p4)
}
   0xb   :  { %19 = dma.hbm_to_vmem [thread:$0]  %s360_s1, 256, %s17_s10, [#allocation5]  }
   0xc   :  { %297 = dma.done.wait [#allocation5], 256  }
   0xd   :  { %298 = vsyncadd [#allocation5], 4294967040  ;;  %v24_v0 = vlaneseq  ;;  %v302_v1 = vmov 1983009808   ;;  %s55_s16 = smul.u32 2246822519, %s359_s0 }
   0xe   :  { %v145_v2 = vunpack.c.l.s4 %v302_v1  ;;  %v137_v19 = vld [vmem:[#allocation4] sm:$0xff]  ;;  %v138_v23 = vld [vmem:[#allocation4 + $0x8] sm:$0xff]  ;;  %s303_s0 = smov [#allocation7]  }
   0xf   :  { %v25_v3 = vshrl.u32 %v24_v0, 7  ;;  %v27_v4 = vand.u32 127, %v24_v0  ;;  %v56_v18 = vstv %s55_s16  ;;  %v139_v26 = vmul.f32 2.0, %v137_v19  ;;  %s245_s1 = sshll.u32 %s303_s0, 4  ;;  %s246_s1 = int_to_ptr.vmem [resolvable:$true] %s245_s1 }
  0x10   :  { %v146_v5 = vunpack.c.0.s8 %v145_v2  ;;  %v327_v31 = vmul.f32 2.0, %v138_v23  ;;  %s277_s17 = scalar_lea.vmem %s246_s1, 256  ;;  %p282_p6 = scmp.lt.s32.totalorder %s246_s1, %s246_s1 }
  0x11   :  { %v28_v6 = vadd.s32 128, %v27_v4  ;;  %v29_v7 = vadd.s32 256, %v27_v4  ;;  %v30_v8 = vadd.s32 384, %v27_v4  ;;  %v37_v9 = vmul.u32 1024, %v25_v3  ;;  %p278_p5 = scmp.ne.s32.totalorder %s246_s1, %s277_s17  ;;  %p283_p7 = scmp.lt.s32.totalorder %s277_s17, %s277_s17 }
  0x12   :  { %v325_v10 = vsub.s32 %v146_v5, %v25_v3  ;;  %v31_v11 = vadd.s32 512, %v27_v4  ;;  %v32_v12 = vadd.s32 640, %v27_v4  ;;  %v33_v13 = vadd.s32 768, %v27_v4 }
  0x13   :  { %v38_v14 = vadd.s32 %v37_v9, %v27_v4  ;;  %v39_v15 = vadd.s32 %v37_v9, %v28_v6  ;;  %v40_v16 = vadd.s32 %v37_v9, %v29_v7  ;;  %v41_v17 = vadd.s32 %v37_v9, %v30_v8  ;;  %p284_p8 = por %p283_p7, %p282_p6 }
  0x14   :  { %v34_v20 = vadd.s32 896, %v27_v4  ;;  %v42_v21 = vadd.s32 %v37_v9, %v31_v11  ;;  %v43_v22 = vadd.s32 %v37_v9, %v32_v12  ;;  %v44_v27 = vadd.s32 %v37_v9, %v33_v13 }
  0x15   :  { %v47_v24 = vmul.u32 2654435761, %v38_v14  ;;  %v48_v25 = vmul.u32 2654435761, %v39_v15  ;;  %v143_v34 = vcombine.high %v139_v26, %v139_v26  ;;  %v330_v35 = vrot.slane %v139_v26, %v325_v10  ;;  %p285_p9 = pnand %p284_p8, %p278_p5 }
  0x16   :  { %v49_v28 = vmul.u32 2654435761, %v40_v16  ;;  %v50_v29 = vmul.u32 2654435761, %v41_v17  ;;  %v45_v30 = vadd.s32 %v37_v9, %v34_v20  ;;  %v160_v20 = vcombine.high %v327_v31, %v327_v31 }
  0x17   :  { %v57_v32 = vadd.s32 %v56_v18, %v47_v24  ;;  %v58_v33 = vadd.s32 %v56_v18, %v48_v25  ;;  %v51_v38 = vmul.u32 2654435761, %v42_v21  ;;  %v52_v39 = vmul.u32 2654435761, %v43_v22 }
  0x18   :  { %v59_v36 = vadd.s32 %v56_v18, %v49_v28  ;;  %v60_v37 = vadd.s32 %v56_v18, %v50_v29  ;;  %v333_v42 = vrot.slane %v143_v34, %v325_v10  ;;  %v158_v43 = vcombine.high %v330_v35, %v330_v35 }
  0x19   :  { %v65_v40 = vshrl.u32 %v57_v32, 16  ;;  %v66_v41 = vshrl.u32 %v58_v33, 16  ;;  %v53_v46 = vmul.u32 2654435761, %v44_v27  ;;  %v54_v47 = vmul.u32 2654435761, %v45_v30 }
  0x1a   :  { %v67_v44 = vshrl.u32 %v59_v36, 16  ;;  %v68_v45 = vshrl.u32 %v60_v37, 16  ;;  %v159_v50 = vcombine.high %v333_v42, %v333_v42  ;;  %v61_v51 = vadd.s32 %v56_v18, %v51_v38 }
  0x1b   :  { %v73_v48 = vxor.u32 %v65_v40, %v57_v32  ;;  %v74_v49 = vxor.u32 %v66_v41, %v58_v33  ;;  %v62_v54 = vadd.s32 %v56_v18, %v52_v39  ;;  %v63_v55 = vadd.s32 %v56_v18, %v53_v46 }
  0x1c   :  { %v75_v52 = vxor.u32 %v67_v44, %v59_v36  ;;  %v76_v53 = vxor.u32 %v68_v45, %v60_v37  ;;  %v64_v58 = vadd.s32 %v56_v18, %v54_v47  ;;  %v69_v59 = vshrl.u32 %v61_v51, 16 }
  0x1d   :  { %v81_v56 = vmul.u32 569420461, %v73_v48  ;;  %v82_v57 = vmul.u32 569420461, %v74_v49  ;;  %v70_v62 = vshrl.u32 %v62_v54, 16  ;;  %v71_v63 = vshrl.u32 %v63_v55, 16 }
  0x1e   :  { %v83_v60 = vmul.u32 569420461, %v75_v52  ;;  %v84_v61 = vmul.u32 569420461, %v76_v53  ;;  %v72_v2 = vshrl.u32 %v64_v58, 16  ;;  %v77_v3 = vxor.u32 %v69_v59, %v61_v51 }
  0x1f   :  { %v89_v0 = vshrl.u32 %v81_v56, 15  ;;  %v90_v1 = vshrl.u32 %v82_v57, 15  ;;  %v78_v6 = vxor.u32 %v70_v62, %v62_v54  ;;  %v79_v7 = vxor.u32 %v71_v63, %v63_v55 }
  0x20   :  { %v91_v4 = vshrl.u32 %v83_v60, 15  ;;  %v92_v5 = vshrl.u32 %v84_v61, 15  ;;  %v80_v11 = vxor.u32 %v72_v2, %v64_v58  ;;  %v85_v12 = vmul.u32 569420461, %v77_v3 }
  0x21   :  { %v97_v8 = vxor.u32 %v89_v0, %v81_v56  ;;  %v98_v9 = vxor.u32 %v90_v1, %v82_v57  ;;  %v86_v15 = vmul.u32 569420461, %v78_v6  ;;  %v87_v16 = vmul.u32 569420461, %v79_v7 }
  0x22   :  { %v99_v13 = vxor.u32 %v91_v4, %v83_v60  ;;  %v100_v14 = vxor.u32 %v92_v5, %v84_v61  ;;  %v93_v19 = vshrl.u32 %v85_v12, 15  ;;  %v88_v27 = vmul.u32 569420461, %v80_v11 }
  0x23   :  { %v105_v17 = vmul.u32 1935289751, %v97_v8  ;;  %v106_v18 = vmul.u32 1935289751, %v98_v9  ;;  %v94_v23 = vshrl.u32 %v86_v15, 15  ;;  %v95_v24 = vshrl.u32 %v87_v16, 15 }
  0x24   :  { %v107_v21 = vmul.u32 1935289751, %v99_v13  ;;  %v108_v22 = vmul.u32 1935289751, %v100_v14  ;;  %v101_v28 = vxor.u32 %v93_v19, %v85_v12  ;;  %v96_v37 = vshrl.u32 %v88_v27, 15 }
  0x25   :  { %v113_v25 = vshrl.u32 %v105_v17, 15  ;;  %v114_v26 = vshrl.u32 %v106_v18, 15  ;;  %v102_v32 = vxor.u32 %v94_v23, %v86_v15  ;;  %v103_v33 = vxor.u32 %v95_v24, %v87_v16 }
  0x26   :  { %v115_v29 = vshrl.u32 %v107_v21, 15  ;;  %v116_v30 = vshrl.u32 %v108_v22, 15  ;;  %v109_v38 = vmul.u32 1935289751, %v101_v28  ;;  %v104_v45 = vxor.u32 %v96_v37, %v88_v27 }
  0x27   :  { %v121_v34 = vxor.u32 %v113_v25, %v105_v17  ;;  %v122_v36 = vxor.u32 %v114_v26, %v106_v18  ;;  %v110_v41 = vmul.u32 1935289751, %v102_v32  ;;  %v111_v44 = vmul.u32 1935289751, %v103_v33 }
  0x28   :  { %v123_v39 = vxor.u32 %v115_v29, %v107_v21  ;;  %v124_v40 = vxor.u32 %v116_v30, %v108_v22  ;;  %v117_v46 = vshrl.u32 %v109_v38, 15  ;;  %v112_v53 = vmul.u32 1935289751, %v104_v45 }
  0x29   :  { %vm129_vm0 = vcmp.lt.u32.totalorder %v121_v34, 2147483648  ;;  %vm130_vm1 = vcmp.lt.u32.totalorder %v122_v36, 2147483648  ;;  %v118_v55 = vshrl.u32 %v110_v41, 15  ;;  %v119_v56 = vshrl.u32 %v111_v44, 15 }
  0x2a   :  { %vm131_vm2 = vcmp.lt.u32.totalorder %v123_v39, 2147483648  ;;  %vm132_vm3 = vcmp.lt.u32.totalorder %v124_v40, 2147483648  ;;  %v185_v47 = vsel %vm129_vm0, %v330_v35, 0.0  ;;  %v186_v48 = vsel %vm130_vm1, %v158_v43, 0.0 }
  0x2b   :  { %v187_v49 = vsel %vm131_vm2, %v333_v42, 0.0  ;;  %v188_v51 = vsel %vm132_vm3, %v159_v50, 0.0  ;;  %v201_v52 = vcombine.low %v185_v47, %v186_v48  ;;  %v125_v57 = vxor.u32 %v117_v46, %v109_v38 }
  0x2c   :  { %v202_v54 = vcombine.low %v187_v49, %v188_v51  ;;  %v120_v59 = vshrl.u32 %v112_v53, 15  ;;  %v167_v60 = vrot.slane %v327_v31, %v325_v10  ;;  %v174_v35 = vrot.slane %v160_v20, %v325_v10 }
  0x2d   :  { %v209_v58 = vrot.slane %v201_v52, %v325_v10  ;;  %v126_v61 = vxor.u32 %v118_v55, %v110_v41  ;;  %v127_v62 = vxor.u32 %v119_v56, %v111_v44  ;;  %vm133_vm4 = vcmp.lt.u32.totalorder %v125_v57, 2147483648 }
  0x2e   :  { %v216_v43 = vrot.slane %v202_v54, %v325_v10  ;;  %v128_v42 = vxor.u32 %v120_v59, %v112_v53  ;;  %v175_v50 = vcombine.high %v167_v60, %v167_v60  ;;  %v176_v63 = vcombine.high %v174_v35, %v174_v35 }
  0x2f   :  { %v189_v0 = vsel %vm133_vm4, %v167_v60, 0.0  ;;  %vm134_vm5 = vcmp.lt.u32.totalorder %v126_v61, 2147483648  ;;  %vm135_vm6 = vcmp.lt.u32.totalorder %v127_v62, 2147483648 }
  0x30   :  { %v217_v1 = vcombine.low %v209_v58, %v216_v43  ;;  %vm136_vm7 = vcmp.lt.u32.totalorder %v128_v42, 2147483648  ;;  %v190_v2 = vsel %vm134_vm5, %v175_v50, 0.0  ;;  %v191_v3 = vsel %vm135_vm6, %v174_v35, 0.0 }
  0x31   :  { %v192_v4 = vsel %vm136_vm7, %v176_v63, 0.0  ;;  %v218_v31 = vcombine.low %v189_v0, %v190_v2 }
  0x32   :  { %237 = vst [vmem:[#allocation7] sm:$0xff] %v217_v1  ;;  %v219_v5 = vcombine.low %v191_v3, %v192_v4 }
  0x33   :  { %v226_v6 = vrot.slane %v218_v31, %v325_v10 }
  0x34   :  { %v233_v7 = vrot.slane %v219_v5, %v325_v10 }
  0x36   :  { %v234_v8 = vcombine.low %v226_v6, %v233_v7 }
  0x38   :  { %238 = vst [vmem:[#allocation7 + $0x8] sm:$0xff] %v234_v8 }
  0x39   :  { %288 = shalt.err (!%p285_p9)
}
  0x3a   :  { %248 = dma.vmem_to_hbm [thread:$0]  %s246_s1, 256, %s361_s2, [#allocation6]  }
  0x3b   :  { %299 = dma.done.wait [#allocation6], 256  }
  0x3c   :  { %300 = vsyncadd [#allocation6], 4294967040 }
  0x3d   :  { %252 = vsyncpa [#allocation5], 1 }
  0x3e   :  { %253 = vsyncpa [#allocation6], 1 }

</bundles_post_ra>
